<compile_context>
chip_gen: v7x
topology: tpu7x:2x2x1
jax: 0.10.0
libtpu: 0.0.40
codegen_flags: <defaults>
</compile_context>

<pallas_src>
import functools

import numpy as np
import jax
import jax.numpy as jnp
from jax import lax
from jax.experimental import pallas as pl
from jax.experimental.pallas import tpu as pltpu

# ---------------- configuration (mirrors the module __init__ args) ----------
NUM_EXPERTS = 4
IN_CHANNELS = 4
OUT_CHANNELS = 8
KERNEL_SIZE = 3
STRIDE = 1
PADDING = 1
DILATION = 1
GROUPS = 1
PROPORTION = 1.0  # proportion=1


# ---------------- rotate_3x3_kernel_adaptive_forloop (JAX glue) -------------
# TODO(synk): the original rotate_3x3_kernel_adaptive_forloop source is not in
# the provided module; reproduced here as per-expert rotation of the 3x3 tap
# grid by angle theta with bilinear resampling and zero outside the kernel.
def _rotate_3x3_kernel(w_e, theta_e):
    # w_e: (C_out, C_in, 3, 3), theta_e: scalar
    offs = jnp.array([-1.0, 0.0, 1.0], dtype=w_e.dtype)
    gy, gx = jnp.meshgrid(offs, offs, indexing="ij")        # target grid (3,3)
    c, s = jnp.cos(theta_e), jnp.sin(theta_e)
    # inverse-rotate target offsets to find the source sampling location
    sy = c * gy + s * gx
    sx = -s * gy + c * gx
    fy, fx = sy + 1.0, sx + 1.0                              # index space [0,2]
    y0, x0 = jnp.floor(fy), jnp.floor(fx)
    ty, tx = fy - y0, fx - x0

    def sample(yi, xi):
        valid = (yi >= 0.0) & (yi <= 2.0) & (xi >= 0.0) & (xi <= 2.0)
        yc = jnp.clip(yi, 0.0, 2.0).astype(jnp.int32)
        xc = jnp.clip(xi, 0.0, 2.0).astype(jnp.int32)
        vals = w_e[:, :, yc, xc]                             # (Co, Ci, 3, 3)
        return jnp.where(valid, vals, 0.0)

    v00 = sample(y0, x0)
    v01 = sample(y0, x0 + 1.0)
    v10 = sample(y0 + 1.0, x0)
    v11 = sample(y0 + 1.0, x0 + 1.0)
    return (v00 * (1.0 - ty) * (1.0 - tx) + v01 * (1.0 - ty) * tx
            + v10 * ty * (1.0 - tx) + v11 * ty * tx)


# ---------------- Pallas kernel: per-sample conv as one fused matmul ---------
def _cond_conv_kernel(x_ref, mask_ref, w_ref, o_ref, *,
                      k, dil, pad, h, w_img, needs_mask):
    # x_ref:    VMEM (TN, C_in, H*W)        raw image, flat in lanes (no HBM pad)
    # mask_ref: VMEM (K*K, H*W)             1.0 where the tap's source pixel is
    #                                       inside the image, 0.0 otherwise
    # w_ref:    VMEM (TN, C_out, K*K*C_in)  per-sample mixed rotated kernels
    #                                       (row order ky, kx, ci)
    # o_ref:    VMEM (TN, C_out, H*W)       final NCHW-flat output (no trim)
    hw = h * w_img
    side = pad * (w_img + 1)                 # max |flat shift| for "same" conv

    x = x_ref[...]                                          # (TN, C_in, HW)
    masks = mask_ref[...]                                   # (K*K, HW)

    # Zero-extend the flat image in VMEM so every tap is an in-bounds,
    # *contiguous* lane slice (shifts range over [-side, +side]).  The values
    # picked up from row wrap-around are killed by the per-tap masks.
    z = jnp.zeros(x.shape[:2] + (side,), dtype=x.dtype)
    ext = jnp.concatenate([z, x, z], axis=-1)               # (TN, C_in, HW+2*side)

    taps = []
    t = 0
    for ky in range(k):
        for kx in range(k):
            s = (ky * dil - pad) * w_img + (kx * dil - pad)  # static python int
            tap = ext[:, :, side + s: side + s + hw]         # (TN, C_in, HW)
            if needs_mask[t]:
                tap = tap * masks[t:t + 1, :]                # zero out-of-image taps
            taps.append(tap)
            t += 1
    patches = jnp.concatenate(taps, axis=1)                  # (TN, K*K*C_in, HW)
    patches = patches.astype(jnp.float32)                    # (no-op in f32 path)

    # One fused batched MXU matmul: contraction K*K*C_in, lane-dense output
    # (HW is a multiple of 128 for the 16x16 case -> unmasked vector stores).
    out = jnp.einsum("nok,nkp->nop", w_ref[...], patches,
                     preferred_element_type=jnp.float32)     # (TN, C_out, HW)
    o_ref[...] = out.astype(o_ref.dtype)


def _pick_batch_block(n):
    """Samples per grid step: <=64, aiming for >=6 grid blocks (>=3 per TC on
    v7x), preferring a divisor of n so no batch padding copy is needed."""
    target = max(1, min(64, -(-n // 6)))
    for t in range(target, max(1, target // 2) - 1, -1):
        if n % t == 0:
            return t
    return target


# ---------------- forward wrapper (NCHW in, NCHW out) ------------------------
def cond_rot_conv2d_forward(x, expert_weight, fc_a_w, fc_a_b, fc_t_w, fc_t_b,
                            use_bf16_inputs=False):
    N, C_in, H, W = x.shape
    E, C_out, K = NUM_EXPERTS, OUT_CHANNELS, KERNEL_SIZE
    assert C_in == IN_CHANNELS
    # Fast path: stride=1, groups=1, "same" padding (flat-shift trick).
    assert STRIDE == 1 and GROUPS == 1
    assert 2 * PADDING == DILATION * (K - 1)
    HW = H * W

    # --- gating (tiny, plain JAX) ---
    avg_x = x.mean(axis=(2, 3))                                   # (N, C_in)
    gate = jax.nn.sigmoid(avg_x @ fc_a_w.T + fc_a_b)              # (N, E)
    theta = jax.nn.sigmoid(avg_x @ fc_t_w.T + fc_t_b) * PROPORTION

    # --- per-sample rotated expert kernels + expert mixture (tiny, plain JAX) ---
    w_exp = expert_weight.reshape(E, C_out, C_in // GROUPS, K, K)
    rot = jax.vmap(lambda th_n: jax.vmap(_rotate_3x3_kernel)(w_exp, th_n))(theta)
    w_mix = jnp.einsum("ne,neoikl->noikl", gate, rot)             # (N, Co, Ci, K, K)
    # contraction order (ky, kx, ci) must match the tap order in the kernel
    w_mix = w_mix.transpose(0, 1, 3, 4, 2).reshape(N, C_out, K * K * C_in)

    # --- flatten the image (free bitcast, no HBM pad round trip) ---
    compute_dtype = jnp.bfloat16 if use_bf16_inputs else x.dtype
    # NOTE: bf16 inputs relax the f32 atol=1e-4 parity; default off.
    x_flat = x.reshape(N, C_in, HW).astype(compute_dtype)

    # --- per-tap validity masks (trace-time numpy constants, (K*K, HW)) ---
    q = np.arange(HW)
    r, c = q // W, q % W
    mask_rows, needs_mask = [], []
    for ky in range(K):
        for kx in range(K):
            rr = r + ky * DILATION - PADDING
            cc = c + kx * DILATION - PADDING
            mask_rows.append(
                ((rr >= 0) & (rr < H) & (cc >= 0) & (cc < W)).astype(np.float32))
            needs_mask.append(
                bool(ky * DILATION != PADDING or kx * DILATION != PADDING))
    mask_arr = jnp.asarray(np.stack(mask_rows, axis=0), dtype=compute_dtype)
    needs_mask = tuple(needs_mask)

    # --- batch blocking: big blocks, but enough blocks for both v7x cores ---
    TN = _pick_batch_block(N)
    G = -(-N // TN)
    N_pad = G * TN
    if N_pad != N:  # only when no nearby divisor of N exists (costs one pad copy)
        x_flat = jnp.pad(x_flat, ((0, N_pad - N), (0, 0), (0, 0)))
        w_mix = jnp.pad(w_mix, ((0, N_pad - N), (0, 0), (0, 0)))

    kernel = functools.partial(_cond_conv_kernel, k=K, dil=DILATION,
                               pad=PADDING, h=H, w_img=W, needs_mask=needs_mask)

    out_flat = pl.pallas_call(
        kernel,
        out_shape=jax.ShapeDtypeStruct((N_pad, C_out, HW), x.dtype),
        grid_spec=pltpu.PrefetchScalarGridSpec(
            num_scalar_prefetch=0,
            grid=(G,),
            in_specs=[
                pl.BlockSpec((TN, C_in, HW), lambda i: (i, 0, 0)),             # image
                pl.BlockSpec((K * K, HW), lambda i: (0, 0)),                   # tap masks
                pl.BlockSpec((TN, C_out, K * K * C_in), lambda i: (i, 0, 0)),  # weights
            ],
            out_specs=pl.BlockSpec((TN, C_out, HW), lambda i: (i, 0, 0)),
        ),
        # batch blocks are independent -> "parallel" lets v7x split the grid
        # across its 2 TensorCores; neutral on single-TC v5e/v6e.
        compiler_params=pltpu.CompilerParams(
            dimension_semantics=("parallel",)),
    )(x_flat, mask_arr, w_mix)

    # Only free ops remain: prefix slice (identity when N_pad == N) + bitcast
    # reshape to NCHW -- the old wide-output column trim copy is gone.
    return out_flat[:N].reshape(N, C_out, H, W)


# ---------------- pure-JAX reference (for correctness check) ----------------
def reference_forward(x, expert_weight, fc_a_w, fc_a_b, fc_t_w, fc_t_b):
    N, C_in, H, W = x.shape
    E, C_out, K = NUM_EXPERTS, OUT_CHANNELS, KERNEL_SIZE
    avg_x = x.mean(axis=(2, 3))
    gate = jax.nn.sigmoid(avg_x @ fc_a_w.T + fc_a_b)
    theta = jax.nn.sigmoid(avg_x @ fc_t_w.T + fc_t_b) * PROPORTION
    w_exp = expert_weight.reshape(E, C_out, C_in, K, K)
    rot = jax.vmap(lambda th_n: jax.vmap(_rotate_3x3_kernel)(w_exp, th_n))(theta)
    w_per = jnp.einsum("ne,neoikl->noikl", gate, rot)          # (N,Co,Ci,K,K)
    outs = []
    for n in range(N):
        o = lax.conv_general_dilated(
            x[n:n + 1], w_per[n],
            window_strides=(STRIDE, STRIDE),
            padding=[(PADDING, PADDING), (PADDING, PADDING)],
            rhs_dilation=(DILATION, DILATION),
            dimension_numbers=("NCHW", "OIHW", "NCHW"))
        outs.append(o[0])
    return jnp.stack(outs, axis=0)


if __name__ == "__main__":
    key = jax.random.PRNGKey(0)
    k1, k2, k3, k4 = jax.random.split(key, 4)
    N, H, W = 2, 16, 16

    x = jax.random.normal(k1, (N, IN_CHANNELS, H, W), jnp.float32)
    # Deterministic synthetic parameters (shapes from the module __init__).
    expert_weight = 0.1 * jax.random.normal(
        k2, (NUM_EXPERTS * OUT_CHANNELS, IN_CHANNELS // GROUPS,
             KERNEL_SIZE, KERNEL_SIZE), jnp.float32)
    fc_a_w = 0.1 * jax.random.normal(k3, (NUM_EXPERTS, IN_CHANNELS), jnp.float32)
    fc_a_b = jnp.zeros((NUM_EXPERTS,), jnp.float32)
    fc_t_w = 0.1 * jax.random.normal(k4, (NUM_EXPERTS, IN_CHANNELS), jnp.float32)
    fc_t_b = jnp.zeros((NUM_EXPERTS,), jnp.float32)

    out = jax.jit(cond_rot_conv2d_forward)(
        x, expert_weight, fc_a_w, fc_a_b, fc_t_w, fc_t_b)
    out = jax.block_until_ready(out)

    ref = reference_forward(x, expert_weight, fc_a_w, fc_a_b, fc_t_w, fc_t_b)
    assert out.shape == (N, OUT_CHANNELS, H, W), out.shape
    assert jnp.allclose(out, ref, atol=1e-4, rtol=1e-4), (
        float(jnp.max(jnp.abs(out - ref))))
    print("KERNEL_OK")
</pallas_src>

<mosaic_0001>
module attributes {stable_mosaic.version = 11 : i64} {
  func.func @_cond_conv_kernel(%arg0: i32, %arg1: memref<1x4x256xf32, #tpu.memory_space<vmem>>, %arg2: memref<9x256xf32, #tpu.memory_space<vmem>>, %arg3: memref<1x8x36xf32, #tpu.memory_space<vmem>>, %arg4: memref<1x8x256xf32, #tpu.memory_space<vmem>>) attributes {dimension_semantics = [#tpu.dimension_semantics<parallel>], iteration_bounds = array<i64: 2>, scalar_prefetch = 0 : i64, scratch_operands = 0 : i64, tpu.core_type = #tpu.core_type<tc>, window_params = [{transform_indices = @transform_0, window_bounds = array<i64: 1, 4, 256>}, {pipeline_mode = #tpu.pipeline_mode<synchronous>, transform_indices = @transform_1, window_bounds = array<i64: 9, 256>}, {transform_indices = @transform_2, window_bounds = array<i64: 1, 8, 36>}, {transform_indices = @transform_3, window_bounds = array<i64: 1, 8, 256>}]} {
    %c0 = arith.constant 0 : index
    %c0_0 = arith.constant 0 : index
    %c0_1 = arith.constant 0 : index
    %0 = vector.load %arg1[%c0, %c0_0, %c0_1] : memref<1x4x256xf32, #tpu.memory_space<vmem>>, vector<1x4x256xf32>
    %c0_2 = arith.constant 0 : index
    %c0_3 = arith.constant 0 : index
    %1 = vector.load %arg2[%c0_2, %c0_3] : memref<9x256xf32, #tpu.memory_space<vmem>>, vector<9x256xf32>
    %cst = arith.constant 0.000000e+00 : f32
    %2 = vector.broadcast %cst : f32 to vector<1x4x17xf32>
    %3 = tpu.concatenate %2, %0, %2 in 2 : vector<1x4x17xf32>, vector<1x4x256xf32>, vector<1x4x17xf32> -> vector<1x4x290xf32>
    %4 = vector.extract_strided_slice %3 {offsets = [0, 0, 0], sizes = [1, 4, 256], strides = [1, 1, 1]} : vector<1x4x290xf32> to vector<1x4x256xf32>
    %5 = vector.extract_strided_slice %1 {offsets = [0, 0], sizes = [1, 256], strides = [1, 1]} : vector<9x256xf32> to vector<1x256xf32>
    %6 = vector.shape_cast %5 : vector<1x256xf32> to vector<1x1x256xf32>
    %7 = vector.broadcast %6 : vector<1x1x256xf32> to vector<1x4x256xf32>
    %8 = arith.mulf %4, %7 : vector<1x4x256xf32>
    %9 = vector.extract_strided_slice %3 {offsets = [0, 0, 1], sizes = [1, 4, 256], strides = [1, 1, 1]} : vector<1x4x290xf32> to vector<1x4x256xf32>
    %10 = vector.extract_strided_slice %1 {offsets = [1, 0], sizes = [1, 256], strides = [1, 1]} : vector<9x256xf32> to vector<1x256xf32>
    %11 = vector.shape_cast %10 : vector<1x256xf32> to vector<1x1x256xf32>
    %12 = vector.broadcast %11 : vector<1x1x256xf32> to vector<1x4x256xf32>
    %13 = arith.mulf %9, %12 : vector<1x4x256xf32>
    %14 = vector.extract_strided_slice %3 {offsets = [0, 0, 2], sizes = [1, 4, 256], strides = [1, 1, 1]} : vector<1x4x290xf32> to vector<1x4x256xf32>
    %15 = vector.extract_strided_slice %1 {offsets = [2, 0], sizes = [1, 256], strides = [1, 1]} : vector<9x256xf32> to vector<1x256xf32>
    %16 = vector.shape_cast %15 : vector<1x256xf32> to vector<1x1x256xf32>
    %17 = vector.broadcast %16 : vector<1x1x256xf32> to vector<1x4x256xf32>
    %18 = arith.mulf %14, %17 : vector<1x4x256xf32>
    %19 = vector.extract_strided_slice %3 {offsets = [0, 0, 16], sizes = [1, 4, 256], strides = [1, 1, 1]} : vector<1x4x290xf32> to vector<1x4x256xf32>
    %20 = vector.extract_strided_slice %1 {offsets = [3, 0], sizes = [1, 256], strides = [1, 1]} : vector<9x256xf32> to vector<1x256xf32>
    %21 = vector.shape_cast %20 : vector<1x256xf32> to vector<1x1x256xf32>
    %22 = vector.broadcast %21 : vector<1x1x256xf32> to vector<1x4x256xf32>
    %23 = arith.mulf %19, %22 : vector<1x4x256xf32>
    %24 = vector.extract_strided_slice %3 {offsets = [0, 0, 17], sizes = [1, 4, 256], strides = [1, 1, 1]} : vector<1x4x290xf32> to vector<1x4x256xf32>
    %25 = vector.extract_strided_slice %3 {offsets = [0, 0, 18], sizes = [1, 4, 256], strides = [1, 1, 1]} : vector<1x4x290xf32> to vector<1x4x256xf32>
    %26 = vector.extract_strided_slice %1 {offsets = [5, 0], sizes = [1, 256], strides = [1, 1]} : vector<9x256xf32> to vector<1x256xf32>
    %27 = vector.shape_cast %26 : vector<1x256xf32> to vector<1x1x256xf32>
    %28 = vector.broadcast %27 : vector<1x1x256xf32> to vector<1x4x256xf32>
    %29 = arith.mulf %25, %28 : vector<1x4x256xf32>
    %30 = vector.extract_strided_slice %3 {offsets = [0, 0, 32], sizes = [1, 4, 256], strides = [1, 1, 1]} : vector<1x4x290xf32> to vector<1x4x256xf32>
    %31 = vector.extract_strided_slice %1 {offsets = [6, 0], sizes = [1, 256], strides = [1, 1]} : vector<9x256xf32> to vector<1x256xf32>
    %32 = vector.shape_cast %31 : vector<1x256xf32> to vector<1x1x256xf32>
    %33 = vector.broadcast %32 : vector<1x1x256xf32> to vector<1x4x256xf32>
    %34 = arith.mulf %30, %33 : vector<1x4x256xf32>
    %35 = vector.extract_strided_slice %3 {offsets = [0, 0, 33], sizes = [1, 4, 256], strides = [1, 1, 1]} : vector<1x4x290xf32> to vector<1x4x256xf32>
    %36 = vector.extract_strided_slice %1 {offsets = [7, 0], sizes = [1, 256], strides = [1, 1]} : vector<9x256xf32> to vector<1x256xf32>
    %37 = vector.shape_cast %36 : vector<1x256xf32> to vector<1x1x256xf32>
    %38 = vector.broadcast %37 : vector<1x1x256xf32> to vector<1x4x256xf32>
    %39 = arith.mulf %35, %38 : vector<1x4x256xf32>
    %40 = vector.extract_strided_slice %3 {offsets = [0, 0, 34], sizes = [1, 4, 256], strides = [1, 1, 1]} : vector<1x4x290xf32> to vector<1x4x256xf32>
    %41 = vector.extract_strided_slice %1 {offsets = [8, 0], sizes = [1, 256], strides = [1, 1]} : vector<9x256xf32> to vector<1x256xf32>
    %42 = vector.shape_cast %41 : vector<1x256xf32> to vector<1x1x256xf32>
    %43 = vector.broadcast %42 : vector<1x1x256xf32> to vector<1x4x256xf32>
    %44 = arith.mulf %40, %43 : vector<1x4x256xf32>
    %45 = tpu.concatenate %8, %13, %18, %23, %24, %29, %34, %39, %44 in 1 : vector<1x4x256xf32>, vector<1x4x256xf32>, vector<1x4x256xf32>, vector<1x4x256xf32>, vector<1x4x256xf32>, vector<1x4x256xf32>, vector<1x4x256xf32>, vector<1x4x256xf32>, vector<1x4x256xf32> -> vector<1x36x256xf32>
    %c0_4 = arith.constant 0 : index
    %c0_5 = arith.constant 0 : index
    %c0_6 = arith.constant 0 : index
    %46 = vector.load %arg3[%c0_4, %c0_5, %c0_6] : memref<1x8x36xf32, #tpu.memory_space<vmem>>, vector<1x8x36xf32>
    "tpu.trace_start"() <{level = 10 : i32, message = "nok,nkp->nop"}> : () -> ()
    %cst_7 = arith.constant dense<0.000000e+00> : vector<1x8x256xf32>
    %47 = tpu.matmul %46, %45, %cst_7 {dimension_numbers = #tpu.dot_dimension_numbers<[2], [1], [1], [2], [0, 0, 0, 1, 1, 2], [0], [0]>} : vector<1x8x36xf32>, vector<1x36x256xf32>, vector<1x8x256xf32> -> vector<1x8x256xf32>
    "tpu.trace_stop"() : () -> ()
    %c0_8 = arith.constant 0 : index
    %c0_9 = arith.constant 0 : index
    %c0_10 = arith.constant 0 : index
    %48 = vector.load %arg4[%c0_8, %c0_9, %c0_10] : memref<1x8x256xf32, #tpu.memory_space<vmem>>, vector<1x8x256xf32>
    tpu.vector_store %arg4[%c0_8, %c0_9, %c0_10], %47 {strides = array<i32>} : memref<1x8x256xf32, #tpu.memory_space<vmem>>, vector<1x8x256xf32>,
    return
  }
  func.func @transform_0(%arg0: i32) -> (i32, i32, i32) {
    %c0_i32 = arith.constant 0 : i32
    %c0_i32_0 = arith.constant 0 : i32
    %c0_i32_1 = arith.constant 0 : i32
    return %arg0, %c0_i32, %c0_i32_0 : i32, i32, i32
  }
  func.func @transform_1(%arg0: i32) -> (i32, i32) {
    %c0_i32 = arith.constant 0 : i32
    %c0_i32_0 = arith.constant 0 : i32
    %c0_i32_1 = arith.constant 0 : i32
    return %c0_i32, %c0_i32_0 : i32, i32
  }
  func.func @transform_2(%arg0: i32) -> (i32, i32, i32) {
    %c0_i32 = arith.constant 0 : i32
    %c0_i32_0 = arith.constant 0 : i32
    %c0_i32_1 = arith.constant 0 : i32
    return %arg0, %c0_i32, %c0_i32_0 : i32, i32, i32
  }
  func.func @transform_3(%arg0: i32) -> (i32, i32, i32) {
    %c0_i32 = arith.constant 0 : i32
    %c0_i32_0 = arith.constant 0 : i32
    %c0_i32_1 = arith.constant 0 : i32
    return %arg0, %c0_i32, %c0_i32_0 : i32, i32, i32
  }
}

</mosaic_0001>

<bundles_post_ra>
// kernel: neg.5
= control target key start
LH: loop header
LB: loop body
LE: loop exit
PB: predicated region body
PF: predicated region fallthrough
CT: control target
= control target key end

     0   :  { %s24_s0 = inlined_call_operand.vmem [shape: f32[2,4], index: 0, kind: input, shape index: {}]   ;;  %s25_s1 = inlined_call_operand.vmem [shape: f32[2,4], index: 1, kind: output, shape index: {}]  }
   0x1   :  { %v2_v0 = vld [vmem:[%s24_s0] sm:$0x3] }
   0x2   :  { %v5_v1 = vxor.u32 2147483648, %v2_v0 }
   0x4   :  { %7 = vst [vmem:[%s25_s1] sm:$0x3] %v5_v1 }

// kernel: cond_rot_conv2d_forward.1
= control target key start
LH: loop header
LB: loop body
LE: loop exit
PB: predicated region body
PF: predicated region fallthrough
CT: control target
= control target key end

     0   :  { %s782_s12 = smov 0   ;;  %s886_s0 = inlined_call_operand.vmem [shape: f32[2,4,256], index: 0, kind: input, shape index: {}]   ;;  %s887_s1 = inlined_call_operand.vmem [shape: f32[9,256], index: 1, kind: input, shape index: {}]   ;;  %s888_s2 = inlined_call_operand.vmem [shape: f32[2,8,36], index: 2, kind: input, shape index: {}]   ;;  %s889_s3 = inlined_call_operand.vmem [shape: f32[2,8,256], index: 3, kind: output, shape index: {}]  }
   0x1 LB: > { %s649_s13 = sadd.s32 4294967295, %s743_s12   ;;  %p653_p0 = scmp.ge.s32.totalorder %s743_s12, 1  ;;  %s743_s12 = sphi %s782_s12, %s13_s12  }
   0x2   : > { %p146_p1 = scmp.lt.s32.totalorder %s743_s12, 3 }
   0x4   : > { %p147_p2 = pnand %p653_p0, %p146_p1 }
   0x5   : > { %p174_p3 = scmp.lt.s32.totalorder (!%p147_p2), %s649_s13, 1  ;;  %v206_v0 = vlaneseq (!%p147_p2)  ;;  %v189_v2 = vld [vmem:[%s887_s1] sm:$0xff] (!%p147_p2)  ;;  %v190_v5 = vld [vmem:[%s887_s1 + $0x8] sm:$0xff] (!%p147_p2)  ;;  %s745_s22 = smov (!%p147_p2), 17   ;;  %v659_v27 = vld [vmem:[%s887_s1 + $0x10] ss:$0 sm:$0xff] (!%p147_p2) }
   0x6   : > { %150 = sbr.rel (%p147_p2) target bundleno = 514 (0x202), region = 32  ;;  %s746_s23 = smov (!%p147_p2), 1   ;;  %v660_v28 = vld [vmem:[%s887_s1 + $0x18] ss:$0 sm:$0xff] (!%p147_p2)  ;;  %vm199_vm0 = vcmask (!%p147_p2), 138240   ;;  %vm252_vm1 = vcmask (!%p147_p2), 15360  }
   0x7   : > { %v207_v1 = vshrl.u32 (!%p147_p2), %v206_v0, 7  ;;  %s747_s24 = smov (!%p147_p2), 16   ;;  %s748_s25 = smov (!%p147_p2), 2   ;;  %vm296_vm2 = vcmask (!%p147_p2), 146432   ;;  %vm230_vm3 = vcmask (!%p147_p2), 7168   ;;  %vm274_vm4 = vcmask (!%p147_p2), 130048  }
   0x8   : > { %s749_s26 = smov (!%p147_p2), 18   ;;  %s750_s27 = smov (!%p147_p2), 33   ;;  %vm340_vm5 = vcmask (!%p147_p2), 269312   ;;  %vm318_vm6 = vcmask (!%p147_p2), 261120   ;;  %vm362_vm7 = vcmask (!%p147_p2), 277504   ;;  %vm426_vm8 = vcmask (!%p147_p2), 908288  }
   0x9   : > { %v218_v3 = vsub.s32 (!%p147_p2), 1, %v207_v1  ;;  %v262_v4 = vsub.s32 (!%p147_p2), 3, %v207_v1  ;;  %v208_v6 = vsub.s32 (!%p147_p2), 0, %v207_v1  ;;  %v240_v14 = vsub.s32 (!%p147_p2), 2, %v207_v1  ;;  %s751_s28 = smov (!%p147_p2), 32   ;;  %s752_s6 = smov (!%p147_p2), 34  }
   0xa   : > { %v284_v17 = vsub.s32 (!%p147_p2), 5, %v207_v1  ;;  %v328_v20 = vsub.s32 (!%p147_p2), 7, %v207_v1  ;;  %v306_v23 = vsub.s32 (!%p147_p2), 6, %v207_v1  ;;  %s753_s7 = smov (!%p147_p2), 111   ;;  %s754_s8 = smov (!%p147_p2), 126   ;;  %vm382_vm9 = vcmask (!%p147_p2), 1039360  }
   0xb   : > { %v219_v8 = vrot.slane (!%p147_p2), %v189_v2, %v218_v3  ;;  %v263_v9 = vrot.slane (!%p147_p2), %v189_v2, %v262_v4  ;;  %v223_v10 = vrot.slane (!%p147_p2), %v190_v5, %v218_v3  ;;  %v213_v11 = vrot.slane (!%p147_p2), %v190_v5, %v208_v6  ;;  %s755_s9 = smov (!%p147_p2), 127   ;;  %s756_s10 = smov (!%p147_p2), 112  }
   0xc   : > { %v209_v12 = vrot.slane (!%p147_p2), %v189_v2, %v208_v6  ;;  %v267_v15 = vrot.slane (!%p147_p2), %v190_v5, %v262_v4  ;;  %v241_v16 = vrot.slane (!%p147_p2), %v189_v2, %v240_v14  ;;  %v245_v18 = vrot.slane (!%p147_p2), %v190_v5, %v240_v14  ;;  %s757_s11 = smov (!%p147_p2), 110   ;;  %s758_s14 = smov (!%p147_p2), 96  }
   0xd   : > { %s891_s13 = smov (!%p174_p3, %s649_s13), 1  ;;  %226 = vrot.lane.b32.xlu1 %v219_v8, %s746_s23  ;;  %v285_v19 = vrot.slane %v189_v2, %v284_v17  ;;  %v289_v21 = vrot.slane %v190_v5, %v284_v17  ;;  %v329_v22 = vrot.slane %v189_v2, %v328_v20  ;;  %v333_v24 = vrot.slane %v190_v5, %v328_v20  ;;  %s759_s15 = smov 95  }
   0xe   : > { %s666_s16 = sshll.u32 %s891_s13, 3  ;;  %v307_v25 = vrot.slane %v189_v2, %v306_v23  ;;  %v311_v26 = vrot.slane %v190_v5, %v306_v23  ;;  %s761_s17 = smov 94   ;;  %vm396_vm10 = vcmask 1031168   ;;  %vm443_vm11 = vcmask 900096  }
   0xf   : > { %s178_s19 = scalar_lea.vmem %s886_s0, %s666_s16  ;;  %vm474_vm12 = vcmask 777216   ;;  %vm457_vm13 = vcmask 785408   ;;  %vm491_vm14 = vcmask 1043456   ;;  %vm413_vm15 = vcmask 916480   ;;  %s182_s20 = scalar_lea.vmem %s888_s2, %s666_s16 }
  0x10   : > { %v188_v7 = vld [vmem:[%s178_s19] sm:$0xff]  ;;  %s667_s21 = sshll.u32 %s891_s13, 4 }
  0x11   : > { %195 = vrot.lane.b32.xlu0 %v188_v7, %s745_s22  ;;  %v194_v13 = vcombine.high %v188_v7, %v188_v7  ;;  %228 = vrot.lane.b32.xlu1 %v223_v10, %s746_s23 }
  0x15   : > { %270 = vrot.lane.b32.xlu0 %v263_v9, %s747_s24  ;;  %272 = vrot.lane.b32.xlu1 %v267_v15, %s747_s24  ;;  %s187_s24 = scalar_lea.vmem %s889_s3, %s667_s21 }
  0x19   : > { %197 = vrot.lane.b32.xlu0 %v194_v13, %s745_s22  ;;  %250 = vrot.lane.b32.xlu1 %v245_v18, %s748_s25 }
  0x1d   : > { %248 = vrot.lane.b32.xlu0 %v241_v16, %s748_s25  ;;  %294 = vrot.lane.b32.xlu1 %v289_v21, %s749_s26 }
  0x21   : > { %292 = vrot.lane.b32.xlu0 %v285_v19, %s749_s26  ;;  %338 = vrot.lane.b32.xlu1 %v333_v24, %s750_s27 }
  0x25   : > { %336 = vrot.lane.b32.xlu0 %v329_v22, %s750_s27  ;;  %316 = vrot.lane.b32.xlu1 %v311_v26, %s751_s28 }
  0x29   : > { %314 = vrot.lane.b32.xlu0 %v307_v25, %s751_s28  ;;  %360 = vrot.lane.b32.xlu1 %v660_v28, %s752_s6 }
  0x2d   : > { %358 = vrot.lane.b32.xlu0 %v659_v27, %s752_s6 }
  0x7f   : > { %v227_v31 = vpop.permute.xlu1 %226 }
  0x83   : > { %v196_v29 = vpop.permute.xlu0 %195  ;;  %v229_v34 = vpop.permute.xlu1 %228 }
  0x84   : > { %v810_v30 = vsel %vm199_vm0, 0.0, %v196_v29  ;;  %v231_v56 = vsel %vm230_vm3, %v227_v31, %v229_v34 }
  0x85   : > { %420 = vrot.lane.b32.xlu0 %v810_v30, %s753_s7  ;;  %v814_v32 = vmul.f32 %v209_v12, %v810_v30  ;;  %v235_v47 = vmul.f32 %v227_v31, %v810_v30  ;;  %v760_v31 = vmov 0.0  }
  0x86   : > { %573 = vmatprep.mubr.f32.mxu0 %v760_v31 }
  0x87   : > { %v271_v33 = vpop.permute.xlu0 %270  ;;  %v273_v37 = vpop.permute.xlu1 %272  ;;  %v373_v52 = vrot.slane %v235_v47, 4 }
  0x88   : > { %v279_v53 = vmul.f32 %v271_v33, %v810_v30  ;;  %v275_v57 = vsel %vm274_vm4, %v271_v33, %v273_v37 }
  0x8a   : > { %v404_v63 = vrot.slane %v279_v53, 4 }
  0x8b   : > { %v198_v35 = vpop.permute.xlu0 %197  ;;  %v251_v42 = vpop.permute.xlu1 %250 }
  0x8c   : > { %v816_v36 = vsel %vm199_vm0, %v196_v29, %v198_v35  ;;  %v821_v40 = vsel %vm199_vm0, %v198_v35, 0.0  ;;  %vm488_vm0 = vcmask 769024  }
  0x8d   : > { %v819_v38 = vmul.f32 %v213_v11, %v816_v36  ;;  %v259_v44 = vmul.f32 %v251_v42, %v821_v40  ;;  %v701_v50 = vpack.i.bf16 %v821_v40, %v816_v36  ;;  %v236_v61 = vmul.f32 %v231_v56, %v816_v36 }
  0x8e   : > { %v237_v62 = vmul.f32 %v229_v34, %v821_v40  ;;  %v280_v5 = vmul.f32 %v275_v57, %v816_v36  ;;  %v281_v6 = vmul.f32 %v273_v37, %v821_v40 }
  0x8f   : > { %v249_v39 = vpop.permute.xlu0 %248  ;;  %v295_v49 = vpop.permute.xlu1 %294  ;;  %v374_v10 = vrot.slane %v236_v61, 4 }
  0x90   : > { %v257_v41 = vmul.f32 %v249_v39, %v810_v30  ;;  %v253_v43 = vsel %vm252_vm1, %v249_v39, %v251_v42  ;;  %v303_v59 = vmul.f32 %v295_v49, %v821_v40  ;;  %v375_v11 = vrot.slane %v237_v62, 4 }
  0x91   : > { %v258_v45 = vmul.f32 %v253_v43, %v816_v36  ;;  %v405_v16 = vrot.slane %v280_v5, 4  ;;  %v406_v17 = vrot.slane %v281_v6, 4  ;;  %vm501_vm1 = vcmask 293888  }
  0x92   : > { %390 = vrot.lane.b32.xlu0 %v257_v41, %s754_s8  ;;  %v436_v9 = vrot.slane %v303_v59, 4  ;;  %v716_v21 = vpack.i.bf16 %v375_v11, %v374_v10 }
  0x93   : > { %v293_v46 = vpop.permute.xlu0 %292  ;;  %v706_v48 = vpack.i.bf16 %v259_v44, %v258_v45  ;;  %v339_v54 = vpop.permute.xlu1 %338  ;;  %v721_v24 = vpack.i.bf16 %v406_v17, %v405_v16 }
  0x94   : > { %v297_v55 = vsel %vm296_vm2, %v293_v46, %v295_v49  ;;  %v301_v58 = vmul.f32 %v293_v46, %v810_v30  ;;  %v347_v14 = vmul.f32 %v339_v54, %v821_v40 }
  0x95   : > { %707 = vrot.lane.b32.xlu1 %v706_v48, %s754_s8  ;;  %v302_v0 = vmul.f32 %v297_v55, %v816_v36 }
  0x96   : > { %702 = vrot.lane.b32.xlu0 %v701_v50, %s753_s7  ;;  %v434_v8 = vrot.slane %v301_v58, 4  ;;  %v467_v19 = vrot.slane %v347_v14, 4 }
  0x97   : > { %v337_v51 = vpop.permute.xlu0 %336  ;;  %v317_v1 = vpop.permute.xlu1 %316  ;;  %v435_v12 = vrot.slane %v302_v0, 4 }
  0x98   : > { %v341_v2 = vsel %vm340_vm5, %v337_v51, %v339_v54  ;;  %v325_v4 = vmul.f32 %v317_v1, %v821_v40  ;;  %v345_v22 = vmul.f32 %v337_v51, %v810_v30 }
  0x99   : > { %376 = vrot.lane.b32.xlu1 %v373_v52, %s755_s9  ;;  %v346_v13 = vmul.f32 %v341_v2, %v816_v36  ;;  %v726_v20 = vpack.i.bf16 %v436_v9, %v435_v12 }
  0x9a   : > { %v465_v27 = vrot.slane %v345_v22, 4 }
  0x9b   : > { %v315_v60 = vpop.permute.xlu0 %314  ;;  %v466_v18 = vrot.slane %v346_v13, 4  ;;  %v361_v26 = vpop.permute.xlu1 %360 }
  0x9c   : > { %v319_v3 = vsel %vm318_vm6, %v315_v60, %v317_v1  ;;  %v323_v28 = vmul.f32 %v315_v60, %v810_v30  ;;  %v369_v34 = vmul.f32 %v361_v26, %v821_v40 }
  0x9d   : > { %v324_v7 = vmul.f32 %v319_v3, %v816_v36  ;;  %407 = vrot.lane.b32.xlu1 %v404_v63, %s756_s10  ;;  %v731_v23 = vpack.i.bf16 %v467_v19, %v466_v18 }
  0x9f   : > { %v711_v15 = vpack.i.bf16 %v325_v4, %v324_v7  ;;  %v359_v25 = vpop.permute.xlu0 %358 }
  0xa0   : > { %v363_v29 = vsel %vm362_vm7, %v359_v25, %v361_v26  ;;  %v367_v35 = vmul.f32 %v359_v25, %v810_v30 }
  0xa1   : > { %437 = vrot.lane.b32.xlu1 %v434_v8, %s757_s11  ;;  %712 = vrot.lane.b32.xlu0 %v711_v15, %s758_s14  ;;  %v368_v33 = vmul.f32 %v363_v29, %v816_v36 }
  0xa5   : > { %727 = vrot.lane.b32.xlu1 %v726_v20, %s757_s11  ;;  %717 = vrot.lane.b32.xlu0 %v716_v21, %s755_s9 }
  0xa9   : > { %732 = vrot.lane.b32.xlu1 %v731_v23, %s759_s15  ;;  %722 = vrot.lane.b32.xlu0 %v721_v24, %s756_s10 }
  0xad   : > { %468 = vrot.lane.b32.xlu1 %v465_v27, %s759_s15  ;;  %451 = vrot.lane.b32.xlu0 %v323_v28, %s758_s14  ;;  %v500_v28 = vld [vmem:[%s182_s20] sm:$0xff] }
  0xb1   : > { %486 = vrot.lane.b32.xlu1 %v369_v34, %s761_s17  ;;  %484 = vrot.lane.b32.xlu0 %v368_v33, %s761_s17 }
  0xb5   : > { %482 = vrot.lane.b32.xlu0 %v367_v35, %s761_s17 }
  0xf7   : > { %v421_v37 = vpop.permute.xlu0 %420 }
 0x104   : > { %v391_v41 = vpop.permute.xlu0 %390 }
 0x107   : > { %v708_v39 = vpop.permute.xlu1 %707 }
 0x108   : > { %v703_v43 = vpop.permute.xlu0 %702  ;;  %v710_v40 = vunpack.i.h.bf16 %v708_v39  ;;  %v709_v50 = vunpack.i.l.bf16 %v708_v39 }
 0x109   : > { %v705_v47 = vunpack.i.h.bf16 %v703_v43  ;;  %v704_v48 = vunpack.i.l.bf16 %v703_v43 }
 0x10a   : > { %v398_v3 = vsel %vm396_vm10, %v709_v50, %v710_v40  ;;  %v397_v4 = vsel %vm396_vm10, %v391_v41, %v709_v50 }
 0x10b   : > { %v377_v42 = vpop.permute.xlu1 %376  ;;  %v428_v56 = vsel %vm426_vm8, %v704_v48, %v705_v47 }
 0x10f   : > { %v408_v44 = vpop.permute.xlu1 %407 }
 0x113   : > { %v438_v45 = vpop.permute.xlu1 %437  ;;  %v713_v46 = vpop.permute.xlu0 %712 }
 0x114   : > { %v715_v52 = vunpack.i.h.bf16 %v713_v46  ;;  %v714_v53 = vunpack.i.l.bf16 %v713_v46 }
 0x116   : > { %v459_v2 = vsel %vm457_vm13, %v714_v53, %v715_v52 }
 0x117   : > { %v728_v36 = vpop.permute.xlu1 %727  ;;  %v718_v49 = vpop.permute.xlu0 %717 }
 0x118   : > { %v720_v51 = vunpack.i.h.bf16 %v718_v49  ;;  %v719_v30 = vunpack.i.l.bf16 %v718_v49  ;;  %v730_v54 = vunpack.i.h.bf16 %v728_v36  ;;  %v729_v55 = vunpack.i.l.bf16 %v728_v36 }
 0x11a   : > { %v384_v59 = vsel %vm382_vm9, %v719_v30, %v720_v51  ;;  %v383_v60 = vsel %vm382_vm9, %v377_v42, %v719_v30  ;;  %v445_v1 = vsel %vm443_vm11, %v729_v55, %v730_v54 }
 0x11b   : > { %v733_v57 = vpop.permute.xlu1 %732  ;;  %v723_v58 = vpop.permute.xlu0 %722  ;;  %v493_v7 = vsel %vm491_vm14, %v819_v38, %v384_v59  ;;  %v492_v12 = vsel %vm491_vm14, %v814_v32, %v383_v60  ;;  %v444_v38 = vsel %vm443_vm11, %v438_v45, %v729_v55  ;;  %v497_v19 = vsel %vm491_vm14, %v428_v56, %v445_v1 }
 0x11c   : > { %v735_v61 = vunpack.i.h.bf16 %v733_v57  ;;  %v734_v62 = vunpack.i.l.bf16 %v733_v57  ;;  %v725_v63 = vunpack.i.h.bf16 %v723_v58  ;;  %v724_v0 = vunpack.i.l.bf16 %v723_v58 }
 0x11d   : > { %v427_v32 = vsel %vm426_vm8, %v421_v37, %v704_v48 }
 0x11e   : > { %v476_v5 = vsel %vm474_vm12, %v734_v62, %v735_v61  ;;  %v415_v6 = vsel %vm413_vm15, %v724_v0, %v725_v63  ;;  %v414_v8 = vsel %vm413_vm15, %v408_v44, %v724_v0  ;;  %v496_v24 = vsel %vm491_vm14, %v427_v32, %v444_v38 }
 0x11f   : > { %v469_v9 = vpop.permute.xlu1 %468  ;;  %v452_v10 = vpop.permute.xlu0 %451  ;;  %v495_v11 = vsel %vm491_vm14, %v398_v3, %v415_v6  ;;  %v494_v13 = vsel %vm491_vm14, %v397_v4, %v414_v8  ;;  %v499_v14 = vsel %vm491_vm14, %v459_v2, %v476_v5 }
 0x120   : > { %v475_v15 = vsel %vm474_vm12, %v469_v9, %v734_v62  ;;  %v458_v16 = vsel %vm457_vm13, %v452_v10, %v714_v53  ;;  %v668_v17 = vpack.c.bf16 %v495_v11, %v493_v7  ;;  %v670_v18 = vpack.c.bf16 %v494_v13, %v492_v12 }
 0x121   : > { %v498_v20 = vsel %vm491_vm14, %v458_v16, %v475_v15  ;;  %v672_v21 = vpack.c.bf16 %v499_v14, %v497_v19 }
 0x122   : > { %669 = vmatprep.subr.bf16.mxu0 %v668_v17  ;;  %v674_v25 = vpack.c.bf16 %v498_v20, %v496_v24 }
 0x123   : > { %v485_v22 = vpop.permute.xlu0 %484  ;;  %671 = vmatpush1.bf16.msra.mxu0 %v670_v18  ;;  %v487_v23 = vpop.permute.xlu1 %486 }
 0x124   : > { %673 = vmatprep.subr.bf16.mxu0 %v672_v21  ;;  %v490_v26 = vsel %vm488_vm0, %v485_v22, %v487_v23 }
 0x127   : > { %v483_v27 = vpop.permute.xlu0 %482  ;;  %675 = vmatpush1.bf16.msra.mxu0 %v674_v25 }
 0x128   : > { %661 = vmatprep.subr.msk.mxu0 %vm491_vm14, %v490_v26  ;;  %v489_v29 = vsel %vm488_vm0, %v483_v27, %v485_v22 }
 0x12b   : > { %662 = vmatpush1.msk.msra.mxu0 %vm491_vm14, %v489_v29 }
 0x12c   : > { %663 = vmatmul.mubr.msk.f32.vlgmr.msra.gmra.mrb[0].mxu0 %vm501_vm1, %v500_v28 }
 0x1ff   : > { %v575_v31 = vpop.f32.mrb[0].mxu0 }
 0x200   : > { %580 = vst [vmem:[%s187_s24] sm:$0xff] %v575_v31  ;;  %v577_v33 = vpop.f32.mrb[1].mxu0 }
 0x201   : > { %581 = vst [vmem:[%s187_s24 + $0x8] sm:$0xff] %v577_v33 }
 0x202 PF: > { %s13_s12 = sadd.s32 1, %s743_s12  }
 0x203   : > { %p10_p4 = scmp.ge.s32.totalorder %s13_s12, 4  }
 0x205   :  { %12 = sbr.rel (!%p10_p4) target bundleno = 1 (0x1), region = 65 }

</bundles_post_ra>
